<compile_context>
chip_gen: v7x
topology: tpu7x:2x2x1
jax: 0.10.0
libtpu: 0.0.40
codegen_flags: <defaults>
</compile_context>

<pallas_src>
import functools

import jax
import jax.numpy as jnp
from jax.experimental import pallas as pl
from jax.experimental.pallas import tpu as pltpu

_MXU_DTYPE = jnp.bfloat16   # matmul-operand dtype (f32 accumulation kept)
_INF = 1e12                 # constant.INFINITY_NUMBER in the reference repo


def _mm2(a, b):
    """2-D matmul on the MXU with f32 accumulation."""
    return jnp.dot(a.astype(_MXU_DTYPE), b.astype(_MXU_DTYPE),
                   preferred_element_type=jnp.float32)


# ----------------------------------------------------------------------------
# Single fused kernel: attention + pool, GCN layers, masked pools, 128 lanes.
# ----------------------------------------------------------------------------
def _fused_gcn_kernel(*refs, num_layers, heads, d_k, have_qk):
    idx = 0
    adj_ref, elmo_ref, bert_ref, rel_ref, bias_ref = refs[:5]
    idx = 5
    if have_qk:
        wq_ref, wk_ref = refs[idx:idx + 2]
        idx += 2
    wv_ref, wo_ref, g_ref, beta_ref = refs[idx:idx + 4]
    idx += 4
    gcn_w_refs = refs[idx:idx + num_layers]
    gcn_b2_refs = refs[idx + num_layers:idx + 2 * num_layers]
    o_ref = refs[idx + 2 * num_layers]

    adj = adj_ref[...]            # (Bb, T, T)   f32
    elmo = elmo_ref[...]          # (Bb, T, Din) f32
    bert = bert_ref[...]          # (Bb, T, D)   f32
    rel = rel_ref[...]            # (Bb, S, D)   f32
    bias = bias_ref[...]          # (Bb, T, 3)   f32 additive (-INF at masked)

    Bb, T, D = bert.shape
    S = rel.shape[1]

    # ------------- relation multi-head attention + residual LayerNorm -------
    # Fused 2-D projections with the original weight layouts; no per-head
    # activation broadcasts, slices, concatenations or head-axis reductions.
    rel2d = rel.reshape(Bb * S, D)
    if S == 1:
        # softmax over a single key is identically 1 -> Q, K, scores, exp and
        # p@V are algebraically dead; ctx == V for every query position.
        v_full = _mm2(rel2d, wv_ref[...])                         # (Bb, H*dv)
        attn = _mm2(v_full, wo_ref[...]).reshape(Bb, 1, D)        # (Bb, 1, D)
    else:
        bert2d = bert.reshape(Bb * T, D)
        q = _mm2(bert2d, wq_ref[...]).reshape(Bb, T, heads, d_k)
        k = _mm2(rel2d, wk_ref[...]).reshape(Bb, S, heads, d_k)
        v = _mm2(rel2d, wv_ref[...]).reshape(Bb, S, heads, -1)
        inv_temp = 1.0 / float(d_k) ** 0.5
        s = jnp.einsum('bthe,bshe->bhts', q.astype(_MXU_DTYPE),
                       k.astype(_MXU_DTYPE),
                       preferred_element_type=jnp.float32) * inv_temp
        s = s - jnp.max(s, axis=-1, keepdims=True)
        p = jnp.exp(s)
        p = p / jnp.sum(p, axis=-1, keepdims=True)                # exact divide
        ctx = jnp.einsum('bhts,bshe->bthe', p.astype(_MXU_DTYPE),
                         v.astype(_MXU_DTYPE),
                         preferred_element_type=jnp.float32)
        attn = _mm2(ctx.reshape(Bb * T, -1), wo_ref[...]).reshape(Bb, T, D)

    res = attn + bert                                             # residual, f32
    mean = jnp.mean(res, axis=-1, keepdims=True)
    var = jnp.mean((res - mean) ** 2, axis=-1, keepdims=True)
    rel_att = (res - mean) * jax.lax.rsqrt(var + 1e-5) * g_ref[...] + beta_ref[...]
    # pool(rel_att_out, mask=None, 'max'): no mask -> plain max over T.
    rel_pool = jnp.max(rel_att, axis=1, keepdims=True)            # (Bb, 1, D)

    # ------------- GCN layers (activation stays VMEM/vreg resident) ---------
    denom = jnp.sum(adj, axis=-1, keepdims=True) + 1.0            # adj.sum(2)+1
    inv_denom = 1.0 / denom                                       # exact divide
    adj_m = adj.astype(_MXU_DTYPE)                                # hoisted cast
    x = elmo
    for l in range(num_layers):
        w = gcn_w_refs[l][...].astype(_MXU_DTYPE)
        b2 = gcn_b2_refs[l][...]                                  # already 2*b
        ax = jnp.einsum('btk,bkd->btd', adj_m, x.astype(_MXU_DTYPE),
                        preferred_element_type=jnp.float32) + x   # A x + x
        in_dim = ax.shape[-1]
        axw = jnp.dot(ax.reshape(Bb * T, in_dim).astype(_MXU_DTYPE), w,
                      preferred_element_type=jnp.float32)
        axw = axw.reshape(Bb, T, -1) + b2                         # (Ax+x)W + 2b
        x = jnp.maximum(axw * inv_denom, 0.0)                     # /denom, relu

    # ------------- masked max-pools (additive -INF bias) + 128-lane output --
    subj_pool = jnp.max(x + bias[:, :, 0:1], axis=1, keepdims=True)
    obj_pool = jnp.max(x + bias[:, :, 1:2], axis=1, keepdims=True)
    gcn_pool = jnp.max(x + bias[:, :, 2:3], axis=1, keepdims=True)

    o_ref[...] = jnp.concatenate([rel_pool, subj_pool, obj_pool, gcn_pool],
                                 axis=-1)


# ----------------------------------------------------------------------------
# Wrapper: one pallas_call over batch blocks for the whole post-encoder pass.
# ----------------------------------------------------------------------------
def gcn_forward(adj, elmo_rnn_output, bert_rnn_output, relation_vec,
                subj_mask, obj_mask, params, num_layers, heads, d_k,
                batch_block=None):
    """Returns cat([rel_att_out_maxpool, subj_gcn_out, obj_gcn_out, gcn_out_pool], -1)."""
    B, T, Din = elmo_rnn_output.shape
    D = bert_rnn_output.shape[-1]
    S = relation_vec.shape[1]
    mem_dim = params["gcn_w"][-1].shape[1]
    out_dim = D + 3 * mem_dim

    if batch_block is None:
        # Largest divisor of B that still leaves >= 2 grid blocks, so both
        # v7x TensorCores stay busy; on single-TC v5e/v6e the bigger blocks
        # simply amortize the per-grid-step overhead.
        batch_block = 1
        for cand in range(B // 2, 0, -1):
            if B % cand == 0:
                batch_block = cand
                break
    assert B % batch_block == 0, (B, batch_block)
    num_blocks = B // batch_block

    # pool_mask = (adj.sum(2) + adj.sum(1)).eq(0); pack all three pool masks as
    # one (B, T, 3) ADDITIVE bias (-INF at masked positions) so the kernel does
    # x + bias instead of three compare+select chains and reads the final GCN
    # activation exactly once.
    pool_mask = ((jnp.sum(adj, axis=2) + jnp.sum(adj, axis=1)) == 0.0)
    masks = jnp.stack([subj_mask[..., 0] > 0.0, obj_mask[..., 0] > 0.0,
                       pool_mask], axis=-1)
    mask_bias = masks.astype(jnp.float32) * (-_INF)                 # (B, T, 3)

    # Fold the doubled bias (W(Ax)+b + W(x)+b == W(Ax+x) + 2b) at trace time.
    gcn_b2 = [2.0 * b for b in params["gcn_b"]]

    def _batch_spec(tail):
        zeros = (0,) * len(tail)
        return pl.BlockSpec((batch_block,) + tuple(tail),
                            lambda b: (b,) + zeros)

    def _const_spec(arr):
        nd = arr.ndim
        return pl.BlockSpec(arr.shape, lambda b: (0,) * nd)

    args = [adj, elmo_rnn_output, bert_rnn_output, relation_vec, mask_bias]
    in_specs = [_batch_spec((T, T)), _batch_spec((T, Din)), _batch_spec((T, D)),
                _batch_spec((S, D)), _batch_spec((T, 3))]

    have_qk = S > 1
    if have_qk:                      # Q/K projections only needed when S > 1
        args += [params["wq"], params["wk"]]
        in_specs += [_const_spec(params["wq"]), _const_spec(params["wk"])]
    args += [params["wv"], params["wo"], params["ln_g"], params["ln_b"]]
    in_specs += [_const_spec(params["wv"]), _const_spec(params["wo"]),
                 _const_spec(params["ln_g"]), _const_spec(params["ln_b"])]
    for w in params["gcn_w"]:
        args.append(w)
        in_specs.append(_const_spec(w))
    for b2 in gcn_b2:
        args.append(b2)
        in_specs.append(_const_spec(b2))

    out = pl.pallas_call(
        functools.partial(_fused_gcn_kernel, num_layers=num_layers,
                          heads=heads, d_k=d_k, have_qk=have_qk),
        out_shape=jax.ShapeDtypeStruct((B, 1, out_dim), jnp.float32),
        grid=(num_blocks,),
        in_specs=in_specs,
        out_specs=pl.BlockSpec((batch_block, 1, out_dim), lambda b: (b, 0, 0)),
        compiler_params=pltpu.CompilerParams(dimension_semantics=("parallel",)),
    )(*args)
    return out[:, 0, :]


# ----------------------------------------------------------------------------
# main
# ----------------------------------------------------------------------------
if __name__ == "__main__":
    B = 2            # batch
    T = 8            # sequence length
    rnn_hidden = 16
    d_model = rnn_hidden * 2          # 32 (== in_dim == relation vec dim)
    mem_dim = 32
    num_layers = 2
    heads = 4
    d_k = d_model // heads            # 8
    rel_drop_rate = 0.1
    n_rel = 4

    key = jax.random.PRNGKey(0)
    ks = jax.random.split(key, 16)

    # --- deterministic synthetic encoder outputs (see TODO at top) ---
    adj = (jax.random.uniform(ks[0], (B, T, T)) > 0.5).astype(jnp.float32)
    elmo_rnn_output = jax.random.normal(ks[1], (B, T, d_model), jnp.float32)
    bert_rnn_output = jax.random.normal(ks[2], (B, T, d_model), jnp.float32)

    # subj/obj masks: 0 at entity positions, 1 elsewhere; eq(0).eq(0) -> mask!=0
    subj_mask_in = jnp.ones((B, T), jnp.int32).at[:, 1].set(0)
    obj_mask_in = jnp.ones((B, T), jnp.int32).at[:, 5].set(0)
    subj_mask = (subj_mask_in != 0).astype(jnp.float32)[..., None]   # (B,T,1)
    obj_mask = (obj_mask_in != 0).astype(jnp.float32)[..., None]

    # relation2vec table + per-example relation "mask" dropout (deterministic)
    relation2vec = jax.random.normal(ks[3], (n_rel, d_model), jnp.float32)
    ctd_label = jnp.array([1, 3], jnp.int32)
    rel_rows = relation2vec[ctd_label]                                # (B, D)
    mask_num = int(d_model * rel_drop_rate)
    keep = jnp.ones((B, d_model), jnp.float32)
    for i in range(B):
        idx = jax.random.permutation(jax.random.fold_in(ks[4], i), d_model)[:mask_num]
        keep = keep.at[i, idx].set(0.0)
    relation_vec = (rel_rows * keep)[:, None, :]                      # (B,1,D)

    # --- deterministic parameters ---
    def lin(k, fan_in, fan_out):
        return jax.random.normal(k, (fan_in, fan_out), jnp.float32) / jnp.sqrt(fan_in)

    params = {
        "gcn_w": [lin(ks[5], d_model, mem_dim), lin(ks[6], mem_dim, mem_dim)],
        "gcn_b": [jnp.zeros((1, mem_dim), jnp.float32) + 0.01,
                  jnp.zeros((1, mem_dim), jnp.float32) + 0.02],
        "wq": lin(ks[7], d_model, heads * d_k),
        "wk": lin(ks[8], d_model, heads * d_k),
        "wv": lin(ks[9], d_model, heads * d_k),
        "wo": lin(ks[10], heads * d_k, d_model),
        "ln_g": jnp.ones((1, d_model), jnp.float32),
        "ln_b": jnp.zeros((1, d_model), jnp.float32),
    }

    out = gcn_forward(adj, elmo_rnn_output, bert_rnn_output, relation_vec,
                      subj_mask, obj_mask, params, num_layers, heads, d_k)
    out = jax.block_until_ready(out)
    assert out.shape == (B, d_model + 3 * mem_dim), out.shape
    print("KERNEL_OK")
</pallas_src>

<mosaic_0001>
module attributes {stable_mosaic.version = 11 : i64} {
  func.func @_fused_gcn_kernel(%arg0: i32, %arg1: memref<1x8x8xf32, #tpu.memory_space<vmem>>, %arg2: memref<1x8x32xf32, #tpu.memory_space<vmem>>, %arg3: memref<1x8x32xf32, #tpu.memory_space<vmem>>, %arg4: memref<1x1x32xf32, #tpu.memory_space<vmem>>, %arg5: memref<1x8x3xf32, #tpu.memory_space<vmem>>, %arg6: memref<32x32xf32, #tpu.memory_space<vmem>>, %arg7: memref<32x32xf32, #tpu.memory_space<vmem>>, %arg8: memref<1x32xf32, #tpu.memory_space<vmem>>, %arg9: memref<1x32xf32, #tpu.memory_space<vmem>>, %arg10: memref<32x32xf32, #tpu.memory_space<vmem>>, %arg11: memref<32x32xf32, #tpu.memory_space<vmem>>, %arg12: memref<1x32xf32, #tpu.memory_space<vmem>>, %arg13: memref<1x32xf32, #tpu.memory_space<vmem>>, %arg14: memref<1x1x128xf32, #tpu.memory_space<vmem>>) attributes {dimension_semantics = [#tpu.dimension_semantics<parallel>], iteration_bounds = array<i64: 2>, scalar_prefetch = 0 : i64, scratch_operands = 0 : i64, tpu.core_type = #tpu.core_type<tc>, window_params = [{transform_indices = @transform_0, window_bounds = array<i64: 1, 8, 8>}, {transform_indices = @transform_1, window_bounds = array<i64: 1, 8, 32>}, {transform_indices = @transform_2, window_bounds = array<i64: 1, 8, 32>}, {transform_indices = @transform_3, window_bounds = array<i64: 1, 1, 32>}, {transform_indices = @transform_4, window_bounds = array<i64: 1, 8, 3>}, {pipeline_mode = #tpu.pipeline_mode<synchronous>, transform_indices = @transform_5, window_bounds = array<i64: 32, 32>}, {pipeline_mode = #tpu.pipeline_mode<synchronous>, transform_indices = @transform_6, window_bounds = array<i64: 32, 32>}, {pipeline_mode = #tpu.pipeline_mode<synchronous>, transform_indices = @transform_7, window_bounds = array<i64: 1, 32>}, {pipeline_mode = #tpu.pipeline_mode<synchronous>, transform_indices = @transform_8, window_bounds = array<i64: 1, 32>}, {pipeline_mode = #tpu.pipeline_mode<synchronous>, transform_indices = @transform_9, window_bounds = array<i64: 32, 32>}, {pipeline_mode = #tpu.pipeline_mode<synchronous>, transform_indices = @transform_10, window_bounds = array<i64: 32, 32>}, {pipeline_mode = #tpu.pipeline_mode<synchronous>, transform_indices = @transform_11, window_bounds = array<i64: 1, 32>}, {pipeline_mode = #tpu.pipeline_mode<synchronous>, transform_indices = @transform_12, window_bounds = array<i64: 1, 32>}, {transform_indices = @transform_13, window_bounds = array<i64: 1, 1, 128>}]} {
    %c0 = arith.constant 0 : index
    %c0_0 = arith.constant 0 : index
    %c0_1 = arith.constant 0 : index
    %0 = vector.load %arg1[%c0, %c0_0, %c0_1] : memref<1x8x8xf32, #tpu.memory_space<vmem>>, vector<1x8x8xf32>
    %c0_2 = arith.constant 0 : index
    %c0_3 = arith.constant 0 : index
    %c0_4 = arith.constant 0 : index
    %1 = vector.load %arg2[%c0_2, %c0_3, %c0_4] : memref<1x8x32xf32, #tpu.memory_space<vmem>>, vector<1x8x32xf32>
    %c0_5 = arith.constant 0 : index
    %c0_6 = arith.constant 0 : index
    %c0_7 = arith.constant 0 : index
    %2 = vector.load %arg3[%c0_5, %c0_6, %c0_7] : memref<1x8x32xf32, #tpu.memory_space<vmem>>, vector<1x8x32xf32>
    %c0_8 = arith.constant 0 : index
    %c0_9 = arith.constant 0 : index
    %c0_10 = arith.constant 0 : index
    %3 = vector.load %arg4[%c0_8, %c0_9, %c0_10] : memref<1x1x32xf32, #tpu.memory_space<vmem>>, vector<1x1x32xf32>
    %c0_11 = arith.constant 0 : index
    %c0_12 = arith.constant 0 : index
    %c0_13 = arith.constant 0 : index
    %4 = vector.load %arg5[%c0_11, %c0_12, %c0_13] : memref<1x8x3xf32, #tpu.memory_space<vmem>>, vector<1x8x3xf32>
    %5 = vector.shape_cast %3 : vector<1x1x32xf32> to vector<1x32xf32>
    %c0_14 = arith.constant 0 : index
    %c0_15 = arith.constant 0 : index
    %6 = vector.load %arg6[%c0_14, %c0_15] : memref<32x32xf32, #tpu.memory_space<vmem>>, vector<32x32xf32>
    %7 = arith.truncf %5 : vector<1x32xf32> to vector<1x32xbf16>
    %8 = arith.truncf %6 : vector<32x32xf32> to vector<32x32xbf16>
    %cst = arith.constant dense<0.000000e+00> : vector<1x32xf32>
    %9 = tpu.matmul %7, %8, %cst {dimension_numbers = #tpu.dot_dimension_numbers<[1], [0], [0], [1], [0, 0, 1, 1], [], []>} : vector<1x32xbf16>, vector<32x32xbf16>, vector<1x32xf32> -> vector<1x32xf32>
    %c0_16 = arith.constant 0 : index
    %c0_17 = arith.constant 0 : index
    %10 = vector.load %arg7[%c0_16, %c0_17] : memref<32x32xf32, #tpu.memory_space<vmem>>, vector<32x32xf32>
    %11 = arith.truncf %9 : vector<1x32xf32> to vector<1x32xbf16>
    %12 = arith.truncf %10 : vector<32x32xf32> to vector<32x32xbf16>
    %cst_18 = arith.constant dense<0.000000e+00> : vector<1x32xf32>
    %13 = tpu.matmul %11, %12, %cst_18 {dimension_numbers = #tpu.dot_dimension_numbers<[1], [0], [0], [1], [0, 0, 1, 1], [], []>} : vector<1x32xbf16>, vector<32x32xbf16>, vector<1x32xf32> -> vector<1x32xf32>
    %14 = vector.shape_cast %13 : vector<1x32xf32> to vector<1x1x32xf32>
    %15 = vector.broadcast %14 : vector<1x1x32xf32> to vector<1x8x32xf32>
    %16 = arith.addf %15, %2 : vector<1x8x32xf32>
    %cst_19 = arith.constant dense<0.000000e+00> : vector<1x8xf32>
    %17 = vector.multi_reduction <add>, %16, %cst_19 [2] : vector<1x8x32xf32> to vector<1x8xf32>
    %18 = vector.shape_cast %17 : vector<1x8xf32> to vector<1x8x1xf32>
    %cst_20 = arith.constant 3.200000e+01 : f32
    %19 = vector.broadcast %cst_20 : f32 to vector<1x8x1xf32>
    %20 = arith.divf %18, %19 : vector<1x8x1xf32>
    %21 = vector.broadcast %20 : vector<1x8x1xf32> to vector<1x8x32xf32>
    %22 = arith.subf %16, %21 : vector<1x8x32xf32>
    %23 = arith.mulf %22, %22 : vector<1x8x32xf32>
    %cst_21 = arith.constant dense<0.000000e+00> : vector<1x8xf32>
    %24 = vector.multi_reduction <add>, %23, %cst_21 [2] : vector<1x8x32xf32> to vector<1x8xf32>
    %25 = vector.shape_cast %24 : vector<1x8xf32> to vector<1x8x1xf32>
    %cst_22 = arith.constant 3.200000e+01 : f32
    %26 = vector.broadcast %cst_22 : f32 to vector<1x8x1xf32>
    %27 = arith.divf %25, %26 : vector<1x8x1xf32>
    %28 = vector.broadcast %20 : vector<1x8x1xf32> to vector<1x8x32xf32>
    %29 = arith.subf %16, %28 : vector<1x8x32xf32>
    %cst_23 = arith.constant 9.99999974E-6 : f32
    %30 = vector.broadcast %cst_23 : f32 to vector<1x8x1xf32>
    %31 = arith.addf %27, %30 : vector<1x8x1xf32>
    %32 = math.rsqrt %31 : vector<1x8x1xf32>
    %33 = vector.broadcast %32 : vector<1x8x1xf32> to vector<1x8x32xf32>
    %34 = arith.mulf %29, %33 : vector<1x8x32xf32>
    %c0_24 = arith.constant 0 : index
    %c0_25 = arith.constant 0 : index
    %35 = vector.load %arg8[%c0_24, %c0_25] : memref<1x32xf32, #tpu.memory_space<vmem>>, vector<1x32xf32>
    %36 = vector.shape_cast %35 : vector<1x32xf32> to vector<1x1x32xf32>
    %37 = vector.broadcast %36 : vector<1x1x32xf32> to vector<1x8x32xf32>
    %38 = arith.mulf %34, %37 : vector<1x8x32xf32>
    %c0_26 = arith.constant 0 : index
    %c0_27 = arith.constant 0 : index
    %39 = vector.load %arg9[%c0_26, %c0_27] : memref<1x32xf32, #tpu.memory_space<vmem>>, vector<1x32xf32>
    %40 = vector.shape_cast %39 : vector<1x32xf32> to vector<1x1x32xf32>
    %41 = vector.broadcast %40 : vector<1x1x32xf32> to vector<1x8x32xf32>
    %42 = arith.addf %38, %41 : vector<1x8x32xf32>
    %cst_28 = arith.constant dense<0xFF800000> : vector<1x32xf32>
    %43 = vector.multi_reduction <maximumf>, %42, %cst_28 [1] : vector<1x8x32xf32> to vector<1x32xf32>
    %44 = vector.shape_cast %43 : vector<1x32xf32> to vector<1x1x32xf32>
    %cst_29 = arith.constant dense<0.000000e+00> : vector<1x8xf32>
    %45 = vector.multi_reduction <add>, %0, %cst_29 [2] : vector<1x8x8xf32> to vector<1x8xf32>
    %46 = vector.shape_cast %45 : vector<1x8xf32> to vector<1x8x1xf32>
    %cst_30 = arith.constant 1.000000e+00 : f32
    %47 = vector.broadcast %cst_30 : f32 to vector<1x8x1xf32>
    %48 = arith.addf %46, %47 : vector<1x8x1xf32>
    %cst_31 = arith.constant 1.000000e+00 : f32
    %49 = vector.broadcast %cst_31 : f32 to vector<1x8x1xf32>
    %50 = arith.divf %49, %48 : vector<1x8x1xf32>
    %51 = arith.truncf %0 : vector<1x8x8xf32> to vector<1x8x8xbf16>
    %c0_32 = arith.constant 0 : index
    %c0_33 = arith.constant 0 : index
    %52 = vector.load %arg10[%c0_32, %c0_33] : memref<32x32xf32, #tpu.memory_space<vmem>>, vector<32x32xf32>
    %53 = arith.truncf %52 : vector<32x32xf32> to vector<32x32xbf16>
    %c0_34 = arith.constant 0 : index
    %c0_35 = arith.constant 0 : index
    %54 = vector.load %arg12[%c0_34, %c0_35] : memref<1x32xf32, #tpu.memory_space<vmem>>, vector<1x32xf32>
    %55 = arith.truncf %1 : vector<1x8x32xf32> to vector<1x8x32xbf16>
    "tpu.trace_start"() <{level = 10 : i32, message = "btk,bkd->btd"}> : () -> ()
    %cst_36 = arith.constant dense<0.000000e+00> : vector<1x8x32xf32>
    %56 = tpu.matmul %51, %55, %cst_36 {dimension_numbers = #tpu.dot_dimension_numbers<[2], [1], [1], [2], [0, 0, 0, 1, 1, 2], [0], [0]>} : vector<1x8x8xbf16>, vector<1x8x32xbf16>, vector<1x8x32xf32> -> vector<1x8x32xf32>
    "tpu.trace_stop"() : () -> ()
    %57 = arith.addf %56, %1 : vector<1x8x32xf32>
    %58 = vector.shape_cast %57 : vector<1x8x32xf32> to vector<8x32xf32>
    %59 = arith.truncf %58 : vector<8x32xf32> to vector<8x32xbf16>
    %cst_37 = arith.constant dense<0.000000e+00> : vector<8x32xf32>
    %60 = tpu.matmul %59, %53, %cst_37 {dimension_numbers = #tpu.dot_dimension_numbers<[1], [0], [0], [1], [0, 0, 1, 1], [], []>} : vector<8x32xbf16>, vector<32x32xbf16>, vector<8x32xf32> -> vector<8x32xf32>
    %61 = vector.shape_cast %60 : vector<8x32xf32> to vector<1x8x32xf32>
    %62 = vector.shape_cast %54 : vector<1x32xf32> to vector<1x1x32xf32>
    %63 = vector.broadcast %62 : vector<1x1x32xf32> to vector<1x8x32xf32>
    %64 = arith.addf %61, %63 : vector<1x8x32xf32>
    %65 = vector.broadcast %50 : vector<1x8x1xf32> to vector<1x8x32xf32>
    %66 = arith.mulf %64, %65 : vector<1x8x32xf32>
    %cst_38 = arith.constant 0.000000e+00 : f32
    %67 = vector.broadcast %cst_38 : f32 to vector<1x8x32xf32>
    %68 = arith.maximumf %66, %67 : vector<1x8x32xf32>
    %c0_39 = arith.constant 0 : index
    %c0_40 = arith.constant 0 : index
    %69 = vector.load %arg11[%c0_39, %c0_40] : memref<32x32xf32, #tpu.memory_space<vmem>>, vector<32x32xf32>
    %70 = arith.truncf %69 : vector<32x32xf32> to vector<32x32xbf16>
    %c0_41 = arith.constant 0 : index
    %c0_42 = arith.constant 0 : index
    %71 = vector.load %arg13[%c0_41, %c0_42] : memref<1x32xf32, #tpu.memory_space<vmem>>, vector<1x32xf32>
    %72 = arith.truncf %68 : vector<1x8x32xf32> to vector<1x8x32xbf16>
    "tpu.trace_start"() <{level = 10 : i32, message = "btk,bkd->btd"}> : () -> ()
    %cst_43 = arith.constant dense<0.000000e+00> : vector<1x8x32xf32>
    %73 = tpu.matmul %51, %72, %cst_43 {dimension_numbers = #tpu.dot_dimension_numbers<[2], [1], [1], [2], [0, 0, 0, 1, 1, 2], [0], [0]>} : vector<1x8x8xbf16>, vector<1x8x32xbf16>, vector<1x8x32xf32> -> vector<1x8x32xf32>
    "tpu.trace_stop"() : () -> ()
    %74 = arith.addf %73, %68 : vector<1x8x32xf32>
    %75 = vector.shape_cast %74 : vector<1x8x32xf32> to vector<8x32xf32>
    %76 = arith.truncf %75 : vector<8x32xf32> to vector<8x32xbf16>
    %cst_44 = arith.constant dense<0.000000e+00> : vector<8x32xf32>
    %77 = tpu.matmul %76, %70, %cst_44 {dimension_numbers = #tpu.dot_dimension_numbers<[1], [0], [0], [1], [0, 0, 1, 1], [], []>} : vector<8x32xbf16>, vector<32x32xbf16>, vector<8x32xf32> -> vector<8x32xf32>
    %78 = vector.shape_cast %77 : vector<8x32xf32> to vector<1x8x32xf32>
    %79 = vector.shape_cast %71 : vector<1x32xf32> to vector<1x1x32xf32>
    %80 = vector.broadcast %79 : vector<1x1x32xf32> to vector<1x8x32xf32>
    %81 = arith.addf %78, %80 : vector<1x8x32xf32>
    %82 = vector.broadcast %50 : vector<1x8x1xf32> to vector<1x8x32xf32>
    %83 = arith.mulf %81, %82 : vector<1x8x32xf32>
    %cst_45 = arith.constant 0.000000e+00 : f32
    %84 = vector.broadcast %cst_45 : f32 to vector<1x8x32xf32>
    %85 = arith.maximumf %83, %84 : vector<1x8x32xf32>
    %86 = vector.extract_strided_slice %4 {offsets = [0, 0, 0], sizes = [1, 8, 1], strides = [1, 1, 1]} : vector<1x8x3xf32> to vector<1x8x1xf32>
    %87 = vector.broadcast %86 : vector<1x8x1xf32> to vector<1x8x32xf32>
    %88 = arith.addf %85, %87 : vector<1x8x32xf32>
    %cst_46 = arith.constant dense<0xFF800000> : vector<1x32xf32>
    %89 = vector.multi_reduction <maximumf>, %88, %cst_46 [1] : vector<1x8x32xf32> to vector<1x32xf32>
    %90 = vector.shape_cast %89 : vector<1x32xf32> to vector<1x1x32xf32>
    %91 = vector.extract_strided_slice %4 {offsets = [0, 0, 1], sizes = [1, 8, 1], strides = [1, 1, 1]} : vector<1x8x3xf32> to vector<1x8x1xf32>
    %92 = vector.broadcast %91 : vector<1x8x1xf32> to vector<1x8x32xf32>
    %93 = arith.addf %85, %92 : vector<1x8x32xf32>
    %cst_47 = arith.constant dense<0xFF800000> : vector<1x32xf32>
    %94 = vector.multi_reduction <maximumf>, %93, %cst_47 [1] : vector<1x8x32xf32> to vector<1x32xf32>
    %95 = vector.shape_cast %94 : vector<1x32xf32> to vector<1x1x32xf32>
    %96 = vector.extract_strided_slice %4 {offsets = [0, 0, 2], sizes = [1, 8, 1], strides = [1, 1, 1]} : vector<1x8x3xf32> to vector<1x8x1xf32>
    %97 = vector.broadcast %96 : vector<1x8x1xf32> to vector<1x8x32xf32>
    %98 = arith.addf %85, %97 : vector<1x8x32xf32>
    %cst_48 = arith.constant dense<0xFF800000> : vector<1x32xf32>
    %99 = vector.multi_reduction <maximumf>, %98, %cst_48 [1] : vector<1x8x32xf32> to vector<1x32xf32>
    %100 = vector.shape_cast %99 : vector<1x32xf32> to vector<1x1x32xf32>
    %101 = tpu.concatenate %44, %90, %95, %100 in 2 : vector<1x1x32xf32>, vector<1x1x32xf32>, vector<1x1x32xf32>, vector<1x1x32xf32> -> vector<1x1x128xf32>
    %c0_49 = arith.constant 0 : index
    %c0_50 = arith.constant 0 : index
    %c0_51 = arith.constant 0 : index
    %102 = vector.load %arg14[%c0_49, %c0_50, %c0_51] : memref<1x1x128xf32, #tpu.memory_space<vmem>>, vector<1x1x128xf32>
    tpu.vector_store %arg14[%c0_49, %c0_50, %c0_51], %101 {strides = array<i32>} : memref<1x1x128xf32, #tpu.memory_space<vmem>>, vector<1x1x128xf32>,
    return
  }
  func.func @transform_0(%arg0: i32) -> (i32, i32, i32) {
    %c0_i32 = arith.constant 0 : i32
    %c0_i32_0 = arith.constant 0 : i32
    %c0_i32_1 = arith.constant 0 : i32
    return %arg0, %c0_i32, %c0_i32_0 : i32, i32, i32
  }
  func.func @transform_1(%arg0: i32) -> (i32, i32, i32) {
    %c0_i32 = arith.constant 0 : i32
    %c0_i32_0 = arith.constant 0 : i32
    %c0_i32_1 = arith.constant 0 : i32
    return %arg0, %c0_i32, %c0_i32_0 : i32, i32, i32
  }
  func.func @transform_2(%arg0: i32) -> (i32, i32, i32) {
    %c0_i32 = arith.constant 0 : i32
    %c0_i32_0 = arith.constant 0 : i32
    %c0_i32_1 = arith.constant 0 : i32
    return %arg0, %c0_i32, %c0_i32_0 : i32, i32, i32
  }
  func.func @transform_3(%arg0: i32) -> (i32, i32, i32) {
    %c0_i32 = arith.constant 0 : i32
    %c0_i32_0 = arith.constant 0 : i32
    %c0_i32_1 = arith.constant 0 : i32
    return %arg0, %c0_i32, %c0_i32_0 : i32, i32, i32
  }
  func.func @transform_4(%arg0: i32) -> (i32, i32, i32) {
    %c0_i32 = arith.constant 0 : i32
    %c0_i32_0 = arith.constant 0 : i32
    %c0_i32_1 = arith.constant 0 : i32
    return %arg0, %c0_i32, %c0_i32_0 : i32, i32, i32
  }
  func.func @transform_5(%arg0: i32) -> (i32, i32) {
    %c0_i32 = arith.constant 0 : i32
    %c0_i32_0 = arith.constant 0 : i32
    %c0_i32_1 = arith.constant 0 : i32
    return %c0_i32, %c0_i32_0 : i32, i32
  }
  func.func @transform_6(%arg0: i32) -> (i32, i32) {
    %c0_i32 = arith.constant 0 : i32
    %c0_i32_0 = arith.constant 0 : i32
    %c0_i32_1 = arith.constant 0 : i32
    return %c0_i32, %c0_i32_0 : i32, i32
  }
  func.func @transform_7(%arg0: i32) -> (i32, i32) {
    %c0_i32 = arith.constant 0 : i32
    %c0_i32_0 = arith.constant 0 : i32
    %c0_i32_1 = arith.constant 0 : i32
    return %c0_i32, %c0_i32_0 : i32, i32
  }
  func.func @transform_8(%arg0: i32) -> (i32, i32) {
    %c0_i32 = arith.constant 0 : i32
    %c0_i32_0 = arith.constant 0 : i32
    %c0_i32_1 = arith.constant 0 : i32
    return %c0_i32, %c0_i32_0 : i32, i32
  }
  func.func @transform_9(%arg0: i32) -> (i32, i32) {
    %c0_i32 = arith.constant 0 : i32
    %c0_i32_0 = arith.constant 0 : i32
    %c0_i32_1 = arith.constant 0 : i32
    return %c0_i32, %c0_i32_0 : i32, i32
  }
  func.func @transform_10(%arg0: i32) -> (i32, i32) {
    %c0_i32 = arith.constant 0 : i32
    %c0_i32_0 = arith.constant 0 : i32
    %c0_i32_1 = arith.constant 0 : i32
    return %c0_i32, %c0_i32_0 : i32, i32
  }
  func.func @transform_11(%arg0: i32) -> (i32, i32) {
    %c0_i32 = arith.constant 0 : i32
    %c0_i32_0 = arith.constant 0 : i32
    %c0_i32_1 = arith.constant 0 : i32
    return %c0_i32, %c0_i32_0 : i32, i32
  }
  func.func @transform_12(%arg0: i32) -> (i32, i32) {
    %c0_i32 = arith.constant 0 : i32
    %c0_i32_0 = arith.constant 0 : i32
    %c0_i32_1 = arith.constant 0 : i32
    return %c0_i32, %c0_i32_0 : i32, i32
  }
  func.func @transform_13(%arg0: i32) -> (i32, i32, i32) {
    %c0_i32 = arith.constant 0 : i32
    %c0_i32_0 = arith.constant 0 : i32
    %c0_i32_1 = arith.constant 0 : i32
    return %arg0, %c0_i32, %c0_i32_0 : i32, i32, i32
  }
}

</mosaic_0001>

<bundles_post_ra>
// kernel: tpu_custom_call.1
= control target key start
LH: loop header
LB: loop body
LE: loop exit
PB: predicated region body
PF: predicated region fallthrough
CT: control target
= control target key end

     0   :  { %s2152_s0 = inlined_call_operand.hbm [shape: f32[2,8,8], index: 0, kind: input, shape index: {}]   ;;  %s2153_s1 = inlined_call_operand.hbm [shape: f32[2,8,32], index: 1, kind: input, shape index: {}]   ;;  %s2154_s2 = inlined_call_operand.hbm [shape: f32[2,8,32], index: 2, kind: input, shape index: {}]   ;;  %s2155_s3 = inlined_call_operand.vmem [shape: f32[2,1,32], index: 3, kind: input, shape index: {}]   ;;  %s2156_s4 = inlined_call_operand.vmem [shape: f32[2,8,3], index: 4, kind: input, shape index: {}]   ;;  %s2157_s5 = inlined_call_operand.vmem [shape: f32[32,32], index: 5, kind: input, shape index: {}]   ;;  %s2158_s6 = inlined_call_operand.hbm [shape: f32[32,32], index: 6, kind: input, shape index: {}]   ;;  %s2159_s7 = inlined_call_operand.vmem [shape: f32[1,32], index: 7, kind: input, shape index: {}]   ;;  %s2160_s8 = inlined_call_operand.vmem [shape: f32[1,32], index: 8, kind: input, shape index: {}]   ;;  %s2161_s9 = inlined_call_operand.hbm [shape: f32[32,32], index: 9, kind: input, shape index: {}]   ;;  %s2162_s10 = inlined_call_operand.hbm [shape: f32[32,32], index: 10, kind: input, shape index: {}]   ;;  %s2163_s11 = inlined_call_operand.vmem [shape: f32[1,32], index: 11, kind: input, shape index: {}]   ;;  %s2164_s12 = inlined_call_operand.vmem [shape: f32[1,32], index: 12, kind: input, shape index: {}]   ;;  %s2165_s13 = inlined_call_operand.hbm [shape: f32[2,1,128], index: 13, kind: output, shape index: {}]  }
   0x1   :  { %2191 = sst [smem:[#allocation25_spill]] %s2153_s1 }
   0x2   :  { %2192 = sst [smem:[#allocation26_spill]] %s2156_s4 }
   0x3   :  { %2193 = sst [smem:[#allocation27_spill]] %s2158_s6 }
   0x4   :  { %2194 = sst [smem:[#allocation28_spill]] %s2159_s7 }
   0x5   :  { %2195 = sst [smem:[#allocation29_spill]] %s2160_s8 }
   0x6   :  { %2196 = sst [smem:[#allocation30_spill]] %s2163_s11 }
   0x7   :  { %2197 = sst [smem:[#allocation31_spill]] %s2164_s12 }
   0x8   :  { %2198 = sst [smem:[#allocation32_spill]] %s2165_s13 }
   0x9   :  { %18 = vsyncpa [#allocation3], 0 }
   0xa   :  { %20 = vsyncpa [#allocation3 + $0x1], 0 }
   0xb   :  { %21 = vsyncpa [#allocation6], 0 }
   0xc   :  { %23 = vsyncpa [#allocation6 + $0x1], 0 }
   0xd   :  { %24 = vsyncpa [#allocation9], 0 }
   0xe   :  { %25 = vsyncpa [#allocation12], 0 }
   0xf   :  { %26 = vsyncpa [#allocation4], 0 }
  0x10   :  { %28 = vsyncpa [#allocation4 + $0x1], 0  ;;  %s1735_s25 = smov 0   ;;  %s1737_s26 = smov 0  }
  0x11   :  { %s1739_s27 = smov 0   ;;  %s1741_s28 = smov 0  }
  0x12 LB: > { %2199 = sst [smem:[#allocation19_spill]] %s1634_s25  ;;  %s1756_s29 = sadd.s32 4294967295, %s1646_s28   ;;  %s1646_s28 = sphi %s1741_s28, %s2243_s28   ;;  %s1642_s27 = sphi %s1739_s27, %s2247_s27   ;;  %s1638_s26 = sphi %s1737_s26, %s2246_s26   ;;  %s1634_s25 = sphi %s1735_s25, %s2245_s25  }
  0x13   : > { %2200 = sst [smem:[#allocation20_spill]] %s1646_s28  ;;  %s1197_s30 = sadd.s32 4294967294, %s1646_s28  }
  0x14   : > { %p54_p0 = scmp.ne.s32.totalorder %s1638_s26, %s1634_s25  ;;  %p2169_p1 = scmp.eq.s32.totalorder %s1756_s29, 0 }
  0x15   : > { %p356_p3 = scmp.eq.s32.totalorder %s1197_s30, 1  ;;  %p1198_p5 = scmp.ge.s32.totalorder %s1646_s28, 1 }
  0x16   : > { %p1765_p4 = por %p2169_p1, %p54_p0  ;;  %p363_p7 = scmp.lt.s32.totalorder %s1646_s28, 3 }
  0x17   : > { %p1770_p6 = por %p356_p3, %p54_p0  ;;  %s1648_s17 = smov [#allocation8]  }
  0x18   : > { %s2201_s14 = scalar_select %p1765_p4, 1, 0 }
  0x19   : > { %s2202_s15 = scalar_select %p1770_p6, 1, 0 }
  0x1a   : > { %p1775_p8 = pnand %p1198_p5, %p363_p7  ;;  %s378_s18 = sshll.u32 %s1648_s17, 4  ;;  %s1779_s18 = int_to_ptr.vmem [resolvable:$true] %s378_s18 }
  0x1b   : > { %2203 = sst [smem:[#allocation21_spill]] %s2202_s15  ;;  %s1791_s20 = sadd.s32 1, %s1646_s28  }
  0x1c   : > { %s2204_s16 = scalar_select %p1775_p8, 1, 0 }
  0x1d   : > { %p1310_p9 = pneg %p1775_p8  ;;  %2206 = sst [smem:[#allocation22_spill]] %s1791_s20 }
  0x1e   : > { %s41_s21 = sadd.s32 1, %s1642_s27  ;;  %s38_s22 = ssub.s32 %s1646_s28, %s1791_s20 }
  0x1f   : > { %p1786_p11 = pnand %p1310_p9, %p2169_p1  ;;  %s2207_s6 = sld [smem:[#allocation27_spill]] }
  0x21   : > { %s2205_s19 = scalar_select %p1786_p11, 1, 0 }
  0x22   : > { %p1804_p13 = pneg %p1786_p11 }
  0x24   : > { %s2208_s25 = scalar_select %p1804_p13, 1, 0 }
  0x25   : > { %s1394_s30 = scalar_lea.hbm %s2207_s6, 512 }
  0x26   : > { %p1395_p12 = scmp.ne.s32.totalorder %s2207_s6, %s1394_s30  ;;  %p1401_p5 = scmp.lt.u32.totalorder %s1394_s30, %s2207_s6 }
  0x28   : > { %p1397_p0 = pnand %p1804_p13, %p1395_p12 }
  0x2a   : > { %p1398_p3 = pneg %p1397_p0 }
  0x2c   : > { %p1403_p7 = pnand %p1401_p5, %p1398_p3 }
  0x2e   : > { %1406 = shalt.err (!%p1403_p7)
}
  0x2f   : > { %s1407_s15 = scalar_lea.vmem %s1779_s18, 512  ;;  %p1415_p2 = scmp.lt.s32.totalorder %s1779_s18, %s1779_s18 }
  0x30   : > { %p1408_p9 = scmp.ne.s32.totalorder %s1779_s18, %s1407_s15  ;;  %p1416_p6 = scmp.lt.s32.totalorder %s1407_s15, %s1407_s15 }
  0x32   : > { %p1410_p10 = pnand %p1408_p9, %p1804_p13  ;;  %p1417_p12 = por %p1416_p6, %p1415_p2 }
  0x34   : > { %p1411_p1 = pneg %p1410_p10 }
  0x36   : > { %p1418_p0 = pnand %p1417_p12, %p1411_p1 }
  0x38   : > { %1421 = shalt.err (!%p1418_p0)
}
  0x39   : > { %s2172_s23 = smov 128   ;;  %s2174_s8 = smov 8  }
  0x3a   : > { %1313 = dma.hbm_to_vmem [thread:$0]  (!%p1786_p11), %s2207_s6, 512, %s1779_s18, [#allocation9], %s2172_s23, %s2172_s23, %s2174_s8  }
  0x3b   : > { %p39_p1 = scmp.eq.s32.totalorder %s38_s22, 0  ;;  %p48_p2 = scmp.ne.s32.totalorder %s1642_s27, %s1638_s26 }
  0x3c   : > { %p49_p6 = scmp.eq.s32.totalorder %s1646_s28, 0  ;;  %p1337_p10 = scmp.lt.s32.totalorder %s1646_s28, 2 }
  0x3d   : > { %s1833_s30 = scalar_select %p39_p1, %s1642_s27, %s41_s21  }
  0x3e   : > { %p50_p3 = por %p49_p6, %p48_p2  ;;  %p2210_p5 = scmp.eq.s32.totalorder %s1756_s29, 1 }
  0x3f   : > { %2209 = sst [smem:[#allocation23_spill]] %s1833_s30  ;;  %s2176_s15 = sand.u32 1, %s1642_s27  }
  0x40   : > { %p1837_p7 = por %p2210_p5, %p48_p2  ;;  %s1843_s20 = sshll.u32 %s1646_s28, 7 }
  0x41   : > { %s1847_s7 = sshll.u32 %s2176_s15, 3  ;;  %p1849_p9 = pnand %p1337_p10, %p50_p3 }
  0x42   : > { %s2211_s17 = scalar_select %p1837_p7, 1, 0 }
  0x43   : > { %s2213_s18 = scalar_select %p1849_p9, 1, 0 }
  0x44   : > { %2212 = sst [smem:[#allocation24_spill]] %s2211_s17  ;;  %s448_s21 = sand.u32 1, %s1646_s28  }
  0x45   : > { %s2214_s1 = sld [smem:[#allocation25_spill]]  ;;  %s452_s23 = scalar_lea.vmem [#allocation5], %s1847_s7 }
  0x46   : > { %s459_s8 = sshll.u32 %s452_s23, 4  ;;  %s1863_s15 = scalar_lea.sflag [#allocation6], %s448_s21  ;;  %s1861_s8 = int_to_ptr.vmem [resolvable:$true] %s459_s8 }
  0x47   : > { %p1869_p0 = pneg %p1849_p9 }
  0x49   : > { %s2215_s30 = scalar_select %p1869_p0, 1, 0 }
  0x4b   : > { %s1858_s24 = scalar_lea.hbm %s2214_s1, %s1843_s20  ;;  %s1427_s28 = scalar_lea.hbm %s2214_s1, 256 }
  0x4c   : > { %s1422_s6 = scalar_lea.hbm %s1858_s24, 128  ;;  %p1428_p6 = scmp.lt.u32.totalorder %s1858_s24, %s2214_s1 }
  0x4d   : > { %p1423_p12 = scmp.ne.s32.totalorder %s1858_s24, %s1422_s6  ;;  %p1429_p10 = scmp.lt.u32.totalorder %s1427_s28, %s1422_s6 }
  0x4e   : > { %p1431_p5 = scmp.lt.u32.totalorder %s1422_s6, %s1858_s24 }
  0x4f   : > { %p1425_p1 = pnand %p1869_p0, %p1423_p12  ;;  %p1430_p3 = por %p1429_p10, %p1428_p6 }
  0x51   : > { %p1426_p2 = pneg %p1425_p1  ;;  %p1432_p7 = por %p1431_p5, %p1430_p3 }
  0x53   : > { %p1433_p4 = pnand %p1432_p7, %p1426_p2 }
  0x55   : > { %1436 = shalt.err (!%p1433_p4)
}
  0x56   : > { %s1437_s21 = scalar_lea.vmem %s1861_s8, 128  ;;  %s1651_s22 = smov [#allocation5]  }
  0x57   : > { %p1438_p12 = scmp.ne.s32.totalorder %s1861_s8, %s1437_s21  ;;  %s1442_s13 = sshll.u32 %s1651_s22, 4  ;;  %s1443_s13 = int_to_ptr.vmem [resolvable:$false] %s1442_s13 }
  0x58   : > { %s1444_s17 = scalar_lea.vmem %s1443_s13, 256  ;;  %p1445_p11 = scmp.lt.s32.totalorder %s1861_s8, %s1443_s13 }
  0x59   : > { %p1440_p1 = pnand %p1438_p12, %p1869_p0  ;;  %p1446_p13 = scmp.lt.s32.totalorder %s1444_s17, %s1437_s21 }
  0x5b   : > { %p1441_p8 = pneg %p1440_p1  ;;  %p1447_p6 = por %p1446_p13, %p1445_p11 }
  0x5d   : > { %p1448_p10 = pnand %p1447_p6, %p1441_p8 }
  0x5f   : > { %1451 = shalt.err (!%p1448_p10)
}
  0x60   : > { %1326 = dma.hbm_to_vmem [thread:$0]  (!%p1849_p9), %s1858_s24, 128, %s1861_s8, %s1863_s15  }
  0x61   : > { %s1652_s6 = smov [#allocation10]   ;;  %s1653_s23 = smov [#allocation11]  }
  0x62   : > { %s397_s28 = sshll.u32 %s1652_s6, 4  ;;  %s410_s1 = sshll.u32 %s1653_s23, 4  ;;  %s398_s28 = int_to_ptr.vmem [resolvable:$true] %s397_s28  ;;  %s411_s1 = int_to_ptr.vmem [resolvable:$true] %s410_s1 }
  0x63   : > { %s1452_s13 = scalar_lea.hbm %s2161_s9, 512  ;;  %p2216_p8 = scmp.ne.s32.totalorder %s2208_s25, 0 }
  0x64   : > { %p1453_p4 = scmp.ne.s32.totalorder %s2161_s9, %s1452_s13  ;;  %p1459_p7 = scmp.lt.u32.totalorder %s1452_s13, %s2161_s9 }
  0x66   : > { %p1455_p11 = pnand %p1453_p4, %p2216_p8 }
  0x68   : > { %p1456_p13 = pneg %p1455_p11 }
  0x6a   : > { %p1461_p2 = pnand %p1459_p7, %p1456_p13 }
  0x6c   : > { %1464 = shalt.err (!%p1461_p2)
}
  0x6d   : > { %s1465_s8 = scalar_lea.vmem %s398_s28, 512  ;;  %p1473_p1 = scmp.lt.s32.totalorder %s398_s28, %s398_s28 }
  0x6e   : > { %p1466_p3 = scmp.ne.s32.totalorder %s398_s28, %s1465_s8  ;;  %p1474_p6 = scmp.lt.s32.totalorder %s1465_s8, %s1465_s8 }
  0x70   : > { %p1468_p5 = pnand %p1466_p3, %p2216_p8  ;;  %p1475_p10 = por %p1474_p6, %p1473_p1 }
  0x72   : > { %p1469_p12 = pneg %p1468_p5 }
  0x74   : > { %p1476_p9 = pnand %p1475_p10, %p1469_p12 }
  0x76   : > { %1479 = shalt.err (!%p1476_p9)
}
  0x77   : > { %p2217_p4 = scmp.ne.s32.totalorder %s2205_s19, 0  ;;  %s2218_s12 = smov 8  }
  0x78   : > { %s2219_s24 = smov 128   ;;  %s1480_s22 = scalar_lea.hbm %s2162_s10, 512 }
  0x79   : > { %1316 = dma.hbm_to_vmem [thread:$0]  (!%p2217_p4), %s2161_s9, 512, %s398_s28, [#allocation9], %s2219_s24, %s2219_s24, %s2218_s12  }
  0x7a   : > { %p1481_p11 = scmp.ne.s32.totalorder %s2162_s10, %s1480_s22  ;;  %p1487_p7 = scmp.lt.u32.totalorder %s1480_s22, %s2162_s10 }
  0x7c   : > { %p1483_p9 = pnand %p1481_p11, %p2216_p8 }
  0x7e   : > { %p1484_p13 = pneg %p1483_p9 }
  0x80   : > { %p1489_p2 = pnand %p1487_p7, %p1484_p13 }
  0x82   : > { %1492 = shalt.err (!%p1489_p2)
}
  0x83   : > { %s1493_s4 = scalar_lea.vmem %s411_s1, 512  ;;  %p1501_p1 = scmp.lt.s32.totalorder %s411_s1, %s411_s1 }
  0x84   : > { %p1494_p3 = scmp.ne.s32.totalorder %s411_s1, %s1493_s4  ;;  %p1502_p6 = scmp.lt.s32.totalorder %s1493_s4, %s1493_s4 }
  0x86   : > { %p1496_p5 = pnand %p1494_p3, %p2216_p8  ;;  %p1503_p10 = por %p1502_p6, %p1501_p1 }
  0x88   : > { %p1497_p12 = pneg %p1496_p5 }
  0x8a   : > { %p1504_p0 = pnand %p1503_p10, %p1497_p12 }
  0x8c   : > { %1507 = shalt.err (!%p1504_p0)
}
  0x8d   : > { %1319 = dma.hbm_to_vmem [thread:$0]  (!%p2217_p4), %s2162_s10, 512, %s411_s1, [#allocation12], %s2219_s24, %s2219_s24, %s2218_s12  }
  0x8e   : > { %s1939_s23 = scalar_lea.hbm %s2152_s0, %s1843_s20  ;;  %s434_s19 = scalar_lea.vmem [#allocation2], %s1847_s7 }
  0x8f   : > { %s441_s22 = sshll.u32 %s434_s19, 4  ;;  %s1948_s17 = scalar_lea.hbm %s2154_s2, %s1843_s20  ;;  %s1942_s22 = int_to_ptr.vmem [resolvable:$true] %s441_s22 }
  0x90   : > { %s2220_s8 = sand.u32 1, %s1642_s27   ;;  %s1508_s12 = scalar_lea.hbm %s1939_s23, 128 }
  0x91   : > { %s431_s1 = scalar_lea.sflag [#allocation3], %s2220_s8  ;;  %p1509_p0 = scmp.ne.s32.totalorder %s1939_s23, %s1508_s12 }
  0x92   : > { %p2221_p8 = scmp.ne.s32.totalorder %s2215_s30, 0  ;;  %s1513_s28 = scalar_lea.hbm %s2152_s0, 256 }
  0x93   : > { %p1514_p9 = scmp.lt.u32.totalorder %s1939_s23, %s2152_s0  ;;  %p1515_p13 = scmp.lt.u32.totalorder %s1513_s28, %s1508_s12 }
  0x94   : > { %p1511_p4 = pnand %p1509_p0, %p2221_p8  ;;  %p1517_p2 = scmp.lt.u32.totalorder %s1508_s12, %s1939_s23 }
  0x95   : > { %p1516_p7 = por %p1515_p13, %p1514_p9 }
  0x96   : > { %p1512_p11 = pneg %p1511_p4 }
  0x97   : > { %p1518_p3 = por %p1517_p2, %p1516_p7 }
  0x99   : > { %p1519_p5 = pnand %p1518_p3, %p1512_p11 }
  0x9b   : > { %1522 = shalt.err (!%p1519_p5)
}
  0x9c   : > { %s1523_s20 = scalar_lea.vmem %s1942_s22, 128  ;;  %s1654_s6 = smov [#allocation2]  }
  0x9d   : > { %p1524_p12 = scmp.ne.s32.totalorder %s1942_s22, %s1523_s20  ;;  %s1528_s19 = sshll.u32 %s1654_s6, 4  ;;  %s1529_s19 = int_to_ptr.vmem [resolvable:$false] %s1528_s19 }
  0x9e   : > { %s1530_s13 = scalar_lea.vmem %s1529_s19, 256  ;;  %p1531_p10 = scmp.lt.s32.totalorder %s1942_s22, %s1529_s19 }
  0x9f   : > { %p1526_p1 = pnand %p1524_p12, %p2221_p8  ;;  %p1532_p0 = scmp.lt.s32.totalorder %s1530_s13, %s1523_s20 }
  0xa1   : > { %p1527_p6 = pneg %p1526_p1  ;;  %p1533_p4 = por %p1532_p0, %p1531_p10 }
  0xa3   : > { %p1534_p9 = pnand %p1533_p4, %p1527_p6 }
  0xa5   : > { %1537 = shalt.err (!%p1534_p9)
}
  0xa6   : > { %p2222_p11 = scmp.ne.s32.totalorder %s2213_s18, 0  ;;  %s470_s21 = scalar_lea.vmem [#allocation7], %s1847_s7 }
  0xa7   : > { %s477_s8 = sshll.u32 %s470_s21, 4  ;;  %s1538_s12 = scalar_lea.hbm %s1948_s17, 128  ;;  %s478_s8 = int_to_ptr.vmem [resolvable:$true] %s477_s8 }
  0xa8   : > { %1323 = dma.hbm_to_vmem [thread:$0]  (!%p2222_p11), %s1939_s23, 128, %s1942_s22, %s431_s1  }
  0xa9   : > { %p1539_p13 = scmp.ne.s32.totalorder %s1948_s17, %s1538_s12  ;;  %s1543_s28 = scalar_lea.hbm %s2154_s2, 256 }
  0xaa   : > { %p1544_p3 = scmp.lt.u32.totalorder %s1948_s17, %s2154_s2  ;;  %p1545_p5 = scmp.lt.u32.totalorder %s1543_s28, %s1538_s12 }
  0xab   : > { %p1541_p7 = pnand %p1539_p13, %p2221_p8  ;;  %p1547_p1 = scmp.lt.u32.totalorder %s1538_s12, %s1948_s17 }
  0xac   : > { %p1546_p12 = por %p1545_p5, %p1544_p3 }
  0xad   : > { %p1542_p2 = pneg %p1541_p7 }
  0xae   : > { %p1548_p6 = por %p1547_p1, %p1546_p12 }
  0xb0   : > { %p1549_p10 = pnand %p1548_p6, %p1542_p2 }
  0xb2   : > { %1552 = shalt.err (!%p1549_p10)
}
  0xb3   : > { %s1553_s7 = scalar_lea.vmem %s478_s8, 128  ;;  %s1655_s23 = smov [#allocation7]  }
  0xb4   : > { %p1554_p0 = scmp.ne.s32.totalorder %s478_s8, %s1553_s7  ;;  %s1558_s22 = sshll.u32 %s1655_s23, 4  ;;  %s1559_s22 = int_to_ptr.vmem [resolvable:$false] %s1558_s22 }
  0xb5   : > { %s1560_s1 = scalar_lea.vmem %s1559_s22, 256  ;;  %p1561_p13 = scmp.lt.s32.totalorder %s478_s8, %s1559_s22 }
  0xb6   : > { %p1556_p4 = pnand %p1554_p0, %p2221_p8  ;;  %p1562_p7 = scmp.lt.s32.totalorder %s1560_s1, %s1553_s7 }
  0xb8   : > { %p1557_p9 = pneg %p1556_p4  ;;  %p1563_p11 = por %p1562_p7, %p1561_p13 }
  0xba   : > { %p1564_p3 = pnand %p1563_p11, %p1557_p9 }
  0xbc   : > { %1567 = shalt.err (!%p1564_p3)
}
  0xbd   : > { %p2223_p5 = scmp.ne.s32.totalorder %s2213_s18, 0  ;;  %p2224_p2 = scmp.ne.s32.totalorder %s2204_s16, 0 }
  0xbe   : > { %s1995_s30 = sand.u32 (!%p2224_p2), 1, %s1638_s26   ;;  %p2225_p8 = scmp.ne.s32.totalorder (!%p2224_p2), %s2201_s14, 0 }
  0xbf   : > { %1329 = dma.hbm_to_vmem [thread:$0]  (!%p2223_p5), %s1948_s17, 128, %s478_s8, %s1863_s15  }
  0xc0   : > { %499 = sbr.rel (%p2224_p2) target bundleno = 1250 (0x4e2), region = 72  ;;  %s1998_s20 = sshll.u32 (!%p2224_p2), %s1995_s30, 3 }
  0xc1   : > { %s502_s6 = scalar_lea.sflag (!%p2224_p2), [#allocation3], %s1995_s30  ;;  %s505_s19 = scalar_lea.vmem (!%p2224_p2), [#allocation2], %s1998_s20 }
  0xc7   : > { %1613 = dma.done.wait (%p2225_p8), %s502_s6, 128  }
  0xc8   : > { %1615 = vsyncadd (%p2225_p8), %s502_s6, 4294967168  ;;  %s510_s16 = sand.u32 1, %s1756_s29   ;;  %s514_s18 = scalar_lea.vmem [#allocation5], %s1998_s20 }
  0xc9   : > { %s511_s15 = scalar_lea.sflag [#allocation6], %s510_s16 }
  0xca   : > { %1617 = dma.done.wait (%p2225_p8), %s511_s15, 256  }
  0xcb   : > { %1619 = vsyncadd (%p2225_p8), %s511_s15, 4294967040  ;;  %s523_s17 = scalar_lea.vmem [#allocation7], %s1998_s20  ;;  %p2226_p11 = scmp.eq.s32.totalorder %s1756_s29, 0 }
  0xcd   : > { %1621 = dma.done.wait (%p2226_p11), [#allocation9], 1024   ;;  %p2227_p12 = pmov %p2226_p11 }
  0xce   : > { %p2228_p1 = pmov %p2226_p11 }
  0xcf   : > { %1623 = vsyncadd (%p2227_p12), [#allocation9], 4294966272 }
  0xd0   : > { %1625 = dma.done.wait (%p2228_p1), [#allocation12], 512   ;;  %p2229_p6 = pmov %p2228_p1 }
  0xd1   : > { %p594_p10 = scmp.lt.s32.totalorder %s1756_s29, 1  ;;  %v1656_v0 = vmov 0.0   ;;  %vm1657_vm0 = vmmov 0   ;;  %v607_v1 = vld [vmem:[%s2157_s5] sm:$0xff]  ;;  %v608_v2 = vld [vmem:[%s2157_s5 + $0x8] sm:$0xff]  ;;  %v609_v3 = vld [vmem:[%s2157_s5 + $0x10] sm:$0xff]  ;;  %v708_v41 = vlaneseq }
  0xd2   : > { %1627 = vsyncadd (%p2229_p6), [#allocation12], 4294966784  ;;  %1246 = vmatprep.subr.bf16.mxu0 %v1656_v0  ;;  %1250 = vmatprep.mubr.msk.bf16.mxu0 %vm1657_vm0, %v1656_v0  ;;  %v612_v4 = vpack.c.bf16 %v608_v2, %v607_v1  ;;  %v610_v5 = vld [vmem:[%s2157_s5 + $0x18] sm:$0xff]  ;;  %v658_v7 = vld [vmem:[#allocation8] sm:$0xff]  ;;  %vm769_vm1 = vcmask 1043456   ;;  %vm614_vm2 = vcmask 261120  }
  0xd3   : > { %1254 = vmatprep.subr.bf16.mxu1 %v1656_v0  ;;  %1258 = vmatprep.mubr.msk.bf16.mxu1 %vm1657_vm0, %v1656_v0  ;;  %s2029_s14 = scalar_select %p594_p10, %s1756_s29, 1  ;;  %v603_v6 = vld [vmem:[%s514_s18] sm:$0xff]  ;;  %v613_v9 = vpack.c.bf16 %v610_v5, %v609_v3  ;;  %v602_v15 = vld [vmem:[%s505_s19] sm:$0xff]  ;;  %vm750_vm3 = vcmask 64512   ;;  %v1658_v38 = vmov 0   ;;  %v1659_v40 = vmov 1  }
  0xd4   : > { %v659_v8 = vld [vmem:[#allocation8 + $0x8] sm:$0xff]  ;;  %1247 = vmatpush3.bf16.msra.mxu0 %v612_v4  ;;  %v765_v12 = vpack.c.bf16 %v603_v6, %v603_v6  ;;  %v2057_v16 = vpack.c.bf16 %v602_v15, %v602_v15  ;;  %v660_v17 = vld [vmem:[#allocation8 + $0x10] sm:$0xff]  ;;  %v661_v18 = vld [vmem:[#allocation8 + $0x18] sm:$0xff]  ;;  %v751_v20 = vsel %vm750_vm3, %v602_v15, 0.0  ;;  %1387 = vset.pattern.permute.xlu1 %v1658_v38  ;;  %s2230_s19 = sld [smem:[#allocation26_spill]]  ;;  %v709_v43 = vshrl.u32 %v708_v41, 7 }
  0xd5   : > { %s596_s25 = scalar_lea.vmem %s2155_s3, %s2029_s14  ;;  %v663_v11 = vpack.c.bf16 %v659_v8, %v658_v7  ;;  %1248 = vmatprep.subr.bf16.mxu0 %v1656_v0  ;;  %v664_v19 = vpack.c.bf16 %v661_v18, %v660_v17  ;;  %752 = vadd.xlane.f32.xlu0 %v751_v20  ;;  %v758_v21 = vld [vmem:[#allocation10] sm:$0xff]  ;;  %v759_v22 = vld [vmem:[#allocation10 + $0x8] sm:$0xff]  ;;  %v760_v27 = vld [vmem:[#allocation10 + $0x10] sm:$0xff]  ;;  %s1216_s22 = sshll.u32 %s2029_s14, 3  ;;  %vm1020_vm4 = vcmask 523264   ;;  %vm1022_vm5 = vcmask 785408  }
  0xd6   : > { %v605_v10 = vld [vmem:[%s596_s25] sm:$0x1]  ;;  %v771_v14 = vsel %vm769_vm1, %v765_v12, 0  ;;  %v762_v24 = vpack.c.bf16 %v759_v22, %v758_v21  ;;  %v761_v28 = vld [vmem:[#allocation10 + $0x18] sm:$0xff]  ;;  %v710_v45 = vsub.s32 0, %v709_v43  ;;  %s2231_s14 = sld [smem:[#allocation30_spill]] }
  0xd7   : > { %1255 = vmatpush3.bf16.msra.mxu1 %v663_v11  ;;  %v611_v13 = vpack.c.bf16 %v605_v10, %v605_v10  ;;  %v763_v31 = vpack.c.bf16 %v761_v28, %v760_v27  ;;  %v604_v47 = vld [vmem:[%s523_s17] sm:$0xff]  ;;  %v866_v2 = vld [vmem:[#allocation11] sm:$0xff]  ;;  %v867_v3 = vld [vmem:[#allocation11 + $0x8] sm:$0xff]  ;;  %s2232_s13 = sld [smem:[#allocation31_spill]]  ;;  %s1661_s21 = smov 64  }
  0xd8   : > { %1256 = vmatprep.subr.bf16.mxu1 %v1656_v0  ;;  %1249 = vmatpush3.bf16.msra.mxu0 %v613_v9  ;;  %v870_v4 = vpack.c.bf16 %v867_v3, %v866_v2  ;;  %v868_v5 = vld [vmem:[#allocation11 + $0x10] sm:$0xff]  ;;  %s1662_s8 = smov 32   ;;  %s1663_s12 = smov 96  }
  0xd9   : > { %1262 = vmatprep.subr.bf16.mxu0 %v1656_v0  ;;  %s2233_s28 = sld [smem:[#allocation28_spill]]  ;;  %s2234_s7 = sld [smem:[#allocation29_spill]] }
  0xda   : > { %s600_s16 = scalar_lea.vmem %s2230_s19, %s1216_s22  ;;  %s2235_s23 = sld [smem:[#allocation24_spill]] }
  0xdb   : > { %1251 = vmatmul.mubr.msk.bf16.vlgmr.msra.gmra.mrb[0].mxu0 %vm614_vm2, %v611_v13  ;;  %1257 = vmatpush3.bf16.msra.mxu1 %v664_v19  ;;  %v606_v39 = vld [vmem:[%s600_s16] sm:$0xff]  ;;  %v1660_v13 = vmov 2   ;;  %s1227_s22 = sshll.u32 %s1756_s29, 4  ;;  %s593_s1 = scalar_lea.vmem [#allocation13], %s1995_s30 }
  0xdc   : > { %1263 = vmatpush3.bf16.msra.mxu0 %v771_v14  ;;  %1264 = vmatprep.mubr.msk.bf16.mxu0 %vm1657_vm0, %v1656_v0  ;;  %v1223_v54 = vld [vmem:[%s2231_s14] ss:$0 sm:$0xff]  ;;  %s1038_s6 = sshll.u32 %s593_s1, 4  ;;  %s2236_s15 = sld [smem:[#allocation32_spill]]  ;;  %s2110_s6 = int_to_ptr.vmem [resolvable:$true] %s1038_s6 }
  0xdd   : > { %1276 = vmatprep.subr.bf16.mxu0 %v1656_v0  ;;  %1268 = vmatprep.subr.bf16.mxu1 %v1656_v0  ;;  %v1226_v19 = vld [vmem:[%s2232_s13] ss:$0 sm:$0xff]  ;;  %s1026_s14 = scalar_lea.sflag [#allocation4], %s1995_s30  ;;  %s1568_s20 = scalar_lea.vmem %s2110_s6, 16 }
  0xde   : > { %972 = vperm.xlu1 %1387, %v606_v39   ;;  %1389 = vset.pattern.permute.xlu0 %v1660_v13  ;;  %p1569_p0 = scmp.ne.s32.totalorder %s2110_s6, %s1568_s20  ;;  %s1664_s29 = smov [#allocation13]  }
  0xdf   : > { %s1572_s17 = sshll.u32 %s1664_s29, 4  ;;  %s1573_s17 = int_to_ptr.vmem [resolvable:$false] %s1572_s17 }
  0xe0   : > { %p2237_p4 = scmp.ne.s32.totalorder %s2235_s23, 0  ;;  %s1574_s13 = scalar_lea.vmem %s1573_s17, 32 }
  0xe1   : > { %p1575_p7 = scmp.lt.s32.totalorder %s2110_s6, %s1573_s17  ;;  %p1576_p3 = scmp.lt.s32.totalorder %s1574_s13, %s1568_s20 }
  0xe2   : > { %1388 = vset.pattern.permute.xlu1 %v1659_v40  ;;  %s2108_s18 = scalar_lea.hbm %s2236_s15, %s1227_s22  ;;  %p1570_p9 = pnand %p1569_p0, %p2237_p4 }
  0xe3   : > { %1265 = vmatmul.mubr.msk.bf16.vlgmr.msra.gmra.mrb[4].mxu0 %vm750_vm3, %v2057_v16  ;;  %984 = vperm.xlu1 %1388, %v606_v39   ;;  %p1577_p5 = por %p1576_p3, %p1575_p7 }
  0xe4   : > { %1278 = vmatprep.mubr.msk.bf16.mxu0 %vm1657_vm0, %v1656_v0  ;;  %p1571_p13 = pneg %p1570_p9 }
  0xe6   : > { %p1578_p2 = pnand %p1577_p5, %p1571_p13 }
 0x15d   : > { %v973_v20 = vpop.permute.xlu1 %972 }
 0x162   : > { %v753_v42 = vpop.xlane.xlu0 %752 }
 0x163   : > { %v754_v44 = vadd.f32 1.0, %v753_v42 }
 0x165   : > { %1390 = vrcp.f32 %v754_v44 }
 0x16f   : > { %v1391_v55 = vpop.eup %1390 }
 0x1ae   : > { %v652_v23 = vpop.f32.mrb[0].mxu0 }
 0x1af   : > { %v662_v25 = vpack.c.bf16 %v652_v23, %v652_v23  ;;  %v1252_v26 = vpop.f32.mrb[1].mxu0 }
 0x1b0   : > { %v655_v29 = vpop.f32.mrb[2].mxu0 }
 0x1b1   : > { %v1253_v30 = vpop.f32.mrb[3].mxu0  ;;  %1259 = vmatmul.mubr.msk.bf16.vlgmr.msra.gmra.mrb[0].mxu1 %vm614_vm2, %v662_v25  ;;  %v985_v29 = vpop.permute.xlu1 %984 }
 0x1b2   : > { %1269 = vmatpush3.bf16.msra.mxu1 %v762_v24  ;;  %1272 = vmatprep.mubr.msk.bf16.mxu1 %vm1657_vm0, %v1656_v0 }
 0x1b3   : > { %1270 = vmatprep.subr.bf16.mxu1 %v1656_v0 }
 0x1b6   : > { %v807_v32 = vpop.f32.mrb[4].mxu0  ;;  %1271 = vmatpush3.bf16.msra.mxu1 %v763_v31 }
 0x1b7   : > { %v808_v33 = vadd.f32 %v807_v32, %v603_v6  ;;  %v1266_v34 = vpop.f32.mrb[5].mxu0  ;;  %1282 = vmatprep.subr.bf16.mxu1 %v1656_v0  ;;  %v869_v6 = vld [vmem:[#allocation11 + $0x18] sm:$0xff] }
 0x1b8   : > { %v810_v35 = vpop.f32.mrb[6].mxu0  ;;  %v871_v7 = vpack.c.bf16 %v869_v6, %v868_v5 }
 0x1b9   : > { %v813_v36 = vpack.c.bf16 %v808_v33, %v808_v33  ;;  %v1267_v37 = vpop.f32.mrb[7].mxu0 }
 0x1bb   : > { %1273 = vmatmul.mubr.msk.bf16.vlgmr.msra.gmra.mrb[4].mxu1 %vm614_vm2, %v813_v36 }
 0x1bc   : > { %1286 = vmatprep.mubr.msk.bf16.mxu1 %vm1657_vm0, %v1656_v0  ;;  %1283 = vmatpush3.bf16.msra.mxu1 %v870_v4 }
 0x1bd   : > { %1284 = vmatprep.subr.bf16.mxu1 %v1656_v0 }
 0x1c0   : > { %1285 = vmatpush3.bf16.msra.mxu1 %v871_v7 }
 0x284   : > { %v702_v46 = vpop.f32.mrb[0].mxu1 }
 0x285   : > { %v711_v48 = vrot.slane %v702_v46, %v710_v45  ;;  %v1260_v49 = vpop.f32.mrb[1].mxu1 }
 0x286   : > { %v705_v50 = vpop.f32.mrb[2].mxu1 }
 0x287   : > { %v1261_v51 = vpop.f32.mrb[3].mxu1  ;;  %v712_v52 = vadd.f32 %v711_v48, %v604_v47 }
 0x289   : > { %v713_v53 = vsel %vm614_vm2, %v712_v52, 0.0 }
 0x28a   : > { %714 = vadd.xlane.f32.xlu0 %v713_v53 }
 0x28e   : > { %v851_v56 = vpop.f32.mrb[4].mxu1 }
 0x28f   : > { %v863_v57 = vadd.f32 %v1223_v54, %v851_v56  ;;  %v1274_v58 = vpop.f32.mrb[5].mxu1 }
 0x290   : > { %v854_v59 = vpop.f32.mrb[6].mxu1 }
 0x291   : > { %v864_v60 = vmul.f32 %v1391_v55, %v863_v57  ;;  %v1275_v61 = vpop.f32.mrb[7].mxu1  ;;  %v1219_v59 = vld [vmem:[%s2233_s28] ss:$0 sm:$0xff] }
 0x292   : > { %v1220_v61 = vld [vmem:[%s2234_s7] ss:$0 sm:$0xff] }
 0x293   : > { %v865_v62 = vmax.f32 %v864_v60, 0.0 }
 0x295   : > { %v873_v63 = vpack.c.bf16 %v865_v62, %v865_v62 }
 0x297   : > { %v875_v1 = vsel %vm769_vm1, %v873_v63, 0 }
 0x298   : > { %1277 = vmatpush3.bf16.msra.mxu0 %v875_v1 }
 0x29b   : > { %1279 = vmatmul.mubr.msk.bf16.vlgmr.msra.gmra.mrb[8].mxu0 %vm750_vm3, %v2057_v16 }
 0x2a0   : > { %996 = vperm.xlu0 %1389, %v606_v39  }
 0x317   : > { %v715_v8 = vpop.xlane.xlu0 %714 }
 0x318   : > { %v717_v9 = vmul.f32 0.03125, %v715_v8 }
 0x31a   : > { %v718_v10 = vsub.f32 %v712_v52, %v717_v9 }
 0x31c   : > { %v719_v11 = vmul.f32 %v718_v10, %v718_v10 }
 0x31e   : > { %v720_v12 = vsel %vm614_vm2, %v719_v11, 0.0 }
 0x31f   : > { %721 = vadd.xlane.f32.xlu1 %v720_v12  ;;  %v997_v27 = vpop.permute.xlu0 %996 }
 0x36e   : > { %v911_v14 = vpop.f32.mrb[8].mxu0 }
 0x36f   : > { %v912_v15 = vadd.f32 %v911_v14, %v865_v62  ;;  %v1280_v16 = vpop.f32.mrb[9].mxu0 }
 0x370   : > { %v914_v17 = vpop.f32.mrb[10].mxu0 }
 0x371   : > { %v917_v18 = vpack.c.bf16 %v912_v15, %v912_v15  ;;  %v1281_v0 = vpop.f32.mrb[11].mxu0 }
 0x373   : > { %1287 = vmatmul.mubr.msk.bf16.vlgmr.msra.gmra.mrb[8].mxu1 %vm614_vm2, %v917_v18 }
 0x3ac   : > { %v722_v54 = vpop.xlane.xlu1 %721 }
 0x446   : > { %v955_v21 = vpop.f32.mrb[8].mxu1 }
 0x447   : > { %v967_v22 = vadd.f32 %v1226_v19, %v955_v21  ;;  %v1288_v23 = vpop.f32.mrb[9].mxu1 }
 0x448   : > { %v958_v24 = vpop.f32.mrb[10].mxu1 }
 0x449   : > { %v968_v25 = vmul.f32 %v1391_v55, %v967_v22  ;;  %v1289_v26 = vpop.f32.mrb[11].mxu1  ;;  %v723_v55 = vmul.f32 0.03125, %v722_v54 }
 0x44b   : > { %v969_v28 = vmax.f32 %v968_v25, 0.0  ;;  %v724_v56 = vadd.f32 1e-05, %v723_v55 }
 0x44d   : > { %v975_v30 = vadd.f32 %v973_v20, %v969_v28  ;;  %v987_v31 = vadd.f32 %v985_v29, %v969_v28  ;;  %v999_v32 = vadd.f32 %v997_v27, %v969_v28  ;;  %1392 = vrsqrt.f32 %v724_v56 }
 0x44f   : > { %v1000_v33 = vsel %vm614_vm2, %v999_v32, -inf  ;;  %v988_v34 = vsel %vm614_vm2, %v987_v31, -inf  ;;  %v976_v35 = vsel %vm614_vm2, %v975_v30, -inf }
 0x450   : > { %v1001_v36 = vrot.slane %v1000_v33, 4  ;;  %v989_v37 = vrot.slane %v988_v34, 4  ;;  %v977_v38 = vrot.slane %v976_v35, 4 }
 0x452   : > { %v1002_v39 = vmax.f32 %v1000_v33, %v1001_v36  ;;  %v990_v40 = vmax.f32 %v988_v34, %v989_v37  ;;  %v978_v41 = vmax.f32 %v976_v35, %v977_v38 }
 0x454   : > { %v1003_v42 = vrot.slane %v1002_v39, 2  ;;  %v991_v43 = vrot.slane %v990_v40, 2  ;;  %v979_v44 = vrot.slane %v978_v41, 2 }
 0x456   : > { %v1004_v45 = vmax.f32 %v1002_v39, %v1003_v42  ;;  %v992_v46 = vmax.f32 %v990_v40, %v991_v43  ;;  %v980_v47 = vmax.f32 %v978_v41, %v979_v44 }
 0x457   : > { %v1393_v57 = vpop.eup %1392 }
 0x458   : > { %v993_v48 = vrot.slane %v992_v46, 1  ;;  %v981_v49 = vrot.slane %v980_v47, 1  ;;  %v1005_v52 = vrot.slane %v1004_v45, 1  ;;  %v726_v58 = vmul.f32 %v1393_v57, %v718_v10 }
 0x45a   : > { %v994_v50 = vmax.f32 %v992_v46, %v993_v48  ;;  %v982_v51 = vmax.f32 %v980_v47, %v981_v49  ;;  %v1006_v53 = vmax.f32 %v1004_v45, %v1005_v52  ;;  %v734_v60 = vmul.f32 %v1219_v59, %v726_v58 }
 0x45c   : > { %1012 = vrot.lane.b32.xlu0 %v994_v50, %s1661_s21  ;;  %1008 = vrot.lane.b32.xlu1 %v982_v51, %s1662_s8  ;;  %v742_v62 = vadd.f32 %v1220_v61, %v734_v60 }
 0x45e   : > { %v743_v63 = vsel %vm614_vm2, %v742_v62, -inf }
 0x45f   : > { %v744_v1 = vrot.slane %v743_v63, 4 }
 0x460   : > { %1016 = vrot.lane.b32.xlu0 %v1006_v53, %s1663_s12 }
 0x461   : > { %v745_v2 = vmax.f32 %v743_v63, %v744_v1 }
 0x463   : > { %v746_v3 = vrot.slane %v745_v2, 2 }
 0x465   : > { %v747_v4 = vmax.f32 %v745_v2, %v746_v3 }
 0x467   : > { %v748_v5 = vrot.slane %v747_v4, 1 }
 0x469   : > { %v749_v6 = vmax.f32 %v747_v4, %v748_v5 }
 0x4ce   : > { %v1009_v7 = vpop.permute.xlu1 %1008  ;;  %v1013_v8 = vpop.permute.xlu0 %1012 }
 0x4cf   : > { %v1019_v9 = vsel %vm614_vm2, %v749_v6, %v1009_v7 }
 0x4d0   : > { %v1021_v10 = vsel %vm1020_vm4, %v1019_v9, %v1013_v8 }
 0x4d2   : > { %v1017_v11 = vpop.permute.xlu0 %1016 }
 0x4d3   : > { %v1023_v12 = vsel %vm1022_vm5, %v1021_v10, %v1017_v11 }
 0x4d4   : > { %1024 = vst [vmem:[%s593_s1] sm:$0x1] %v1023_v12 }
 0x4d5   : > { %1581 = shalt.err (!%p1578_p2)
}
 0x4d6   : > { %s1582_s30 = scalar_lea.hbm %s2108_s18, 16  ;;  %s1586_s12 = scalar_lea.hbm %s2236_s15, 32 }
 0x4d7   : > { %p1583_p8 = scmp.ne.s32.totalorder %s2108_s18, %s1582_s30  ;;  %p1587_p1 = scmp.lt.u32.totalorder %s2108_s18, %s2236_s15 }
 0x4d8   : > { %p1588_p6 = scmp.lt.u32.totalorder %s1586_s12, %s1582_s30  ;;  %p1590_p0 = scmp.lt.u32.totalorder %s1582_s30, %s2108_s18 }
 0x4d9   : > { %p1584_p11 = pnand %p1583_p8, %p2237_p4 }
 0x4da   : > { %p1589_p10 = por %p1588_p6, %p1587_p1 }
 0x4db   : > { %p1585_p12 = pneg %p1584_p11 }
 0x4dc   : > { %p1591_p9 = por %p1590_p0, %p1589_p10 }
 0x4de   : > { %p1592_p13 = pnand %p1591_p9, %p1585_p12 }
 0x4e0   : > { %1595 = shalt.err (!%p1592_p13)
}
 0x4e1   : > { %1308 = dma.vmem_to_hbm [thread:$0]  (%p2237_p4), %s2110_s6, 16, %s2108_s18, %s1026_s14  }
 0x4e2 PF: > { %s2238_s28 = sld [smem:[#allocation19_spill]]  ;;  %s2239_s11 = sld [smem:[#allocation21_spill]] }
 0x4e3   : > { %s2240_s25 = sld [smem:[#allocation20_spill]] }
 0x4e8   : > { %s1050_s7 = sand.u32 1, %s2238_s28   ;;  %p2241_p7 = scmp.ne.s32.totalorder %s2239_s11, 0 }
 0x4e9   : > { %p2242_p3 = scmp.ge.s32.totalorder %s2240_s25, 2  ;;  %s1051_s22 = scalar_lea.sflag [#allocation4], %s1050_s7 }
 0x4eb   : > { %p1331_p5 = pnand %p2242_p3, %p2241_p7 }
 0x4ed   : > { %1629 = dma.done.wait (!%p1331_p5), %s1051_s22, 16  }
 0x4ee   : > { %1631 = vsyncadd (!%p1331_p5), %s1051_s22, 4294967280  ;;  %s2243_s28 = sld [smem:[#allocation22_spill]]  ;;  %s2244_s1 = sld [smem:[#allocation23_spill]] }
 0x4ef   : > { %s2245_s25 = smov %s1638_s26  ;;  %s2246_s26 = smov %s1642_s27 }
 0x4f4   : > { %p31_p2 = scmp.ge.s32.totalorder %s2243_s28, 4   ;;  %s2247_s27 = smov %s2244_s1 }
 0x4f6   :  { %33 = sbr.rel (!%p31_p2) target bundleno = 18 (0x12), region = 159 }
 0x4fd   :  { %1055 = vsyncpa [#allocation3], 1 }
 0x4fe   :  { %1057 = vsyncpa [#allocation3 + $0x1], 1 }
 0x4ff   :  { %1058 = vsyncpa [#allocation6], 1 }
 0x500   :  { %1060 = vsyncpa [#allocation6 + $0x1], 1 }
 0x501   :  { %1061 = vsyncpa [#allocation9], 1 }
 0x502   :  { %1062 = vsyncpa [#allocation12], 1 }
 0x503   :  { %1063 = vsyncpa [#allocation4], 1 }
 0x504   :  { %1065 = vsyncpa [#allocation4 + $0x1], 1 }

</bundles_post_ra>
